<compile_context>
chip_gen: v5e
topology: v5e:2x2
jax: 0.10.0
libtpu: 0.0.40
codegen_flags: <defaults>
</compile_context>

<pallas_src>
import functools
import math

import jax
import jax.numpy as jnp
from jax import lax
from jax.experimental import pallas as pl
from jax.experimental.pallas import tpu as pltpu


def _round_up(n, m):
    return ((n + m - 1) // m) * m


def _pick_tile(n, cap, mult=8):
    """Largest multiple-of-`mult` divisor of n that is <= cap (or n itself if n <= cap)."""
    if n <= cap:
        return n
    start = cap - (cap % mult)
    for t in range(start, mult - 1, -mult):
        if n % t == 0:
            return t
    # TODO(synk): pad T instead of falling back to one giant tile for awkward lengths.
    return n


def _vmem_limit_bytes():
    """Chip-aware scoped-VMEM limit: ~75% of physical, capped at 100 MiB
    (v5e/v6e: 128 MiB physical; v7x: 64 MiB physical)."""
    try:
        cap = int(pltpu.get_tpu_info().vmem_capacity_bytes)
    except Exception:
        cap = 64 * 1024 * 1024
    return int(min(cap * 3 // 4, 100 * 1024 * 1024))


# ---------------------------------------------------------------------------
# Kernel 1: fused QKV projection (done once; q is pre-scaled by C**-0.5 via Wq)
# ---------------------------------------------------------------------------
def _qkv_proj_kernel(x_ref, w_ref, q_ref, kv_ref, acc_ref, *, Hp):
    # x_ref : (1, tt, tc)   rows of x
    # w_ref : (tc, 3*Hp)    fused [scale*Wq | Wk | Wv], pre-transposed, zero-padded
    # q_ref : (1, tt, Hp)   pre-scaled q
    # kv_ref: (1, tt, 2*Hp) [k | v]
    ci = pl.program_id(2)

    @pl.when(ci == 0)
    def _init():
        acc_ref[...] = jnp.zeros_like(acc_ref)

    acc_ref[...] += jnp.dot(x_ref[0], w_ref[...],
                            preferred_element_type=jnp.float32)

    @pl.when(ci == pl.num_programs(2) - 1)
    def _finalize():
        acc = acc_ref[...]
        q_ref[0] = acc[:, :Hp].astype(q_ref.dtype)     # lane-aligned static slices
        kv_ref[0] = acc[:, Hp:].astype(kv_ref.dtype)


# ---------------------------------------------------------------------------
# Kernel 2: flash attention over precomputed q / [k|v] tiles
# ---------------------------------------------------------------------------
def _flash_kernel(q_ref, kv_ref, o_ref, m_scr, l_scr, acc_scr, *, tq, tk, Hp):
    # q_ref : (1, tq, Hp)    pre-scaled queries for this q tile
    # kv_ref: (1, tk, 2*Hp)  [k | v] for this kv tile (clamped at the diagonal)
    # o_ref : (1, tq, Hp)    lane-dense output slab
    qi = pl.program_id(1)
    ki = pl.program_id(2)
    nk = pl.num_programs(2)

    @pl.when(ki == 0)
    def _init():
        m_scr[...] = jnp.full(m_scr.shape, -jnp.inf, dtype=m_scr.dtype)
        l_scr[...] = jnp.zeros(l_scr.shape, dtype=l_scr.dtype)
        acc_scr[...] = jnp.zeros(acc_scr.shape, dtype=acc_scr.dtype)

    last_needed = jnp.minimum(nk - 1, ((qi + 1) * tq - 1) // tk)
    block_needed = ki * tk < (qi + 1) * tq     # skip blocks strictly above the diagonal

    @pl.when(block_needed)
    def _compute():
        kv = kv_ref[0]
        k = kv[:, :Hp]          # (tk, Hp)
        v = kv[:, Hp:]          # (tk, Hp)
        q = q_ref[0]            # (tq, Hp), already scaled by C**-0.5

        # Contract the head dim directly (transposed-rhs MXU matmul, no explicit k.T).
        s = lax.dot_general(q, k, (((1,), (1,)), ((), ())),
                            preferred_element_type=jnp.float32)   # (tq, tk)

        def _update(scores):
            m_prev = m_scr[...]
            m_new = jnp.maximum(m_prev, jnp.max(scores, axis=-1, keepdims=True))
            alpha = jnp.exp(m_prev - m_new)
            p = jnp.exp(scores - m_new)
            l_scr[...] = alpha * l_scr[...] + jnp.sum(p, axis=-1, keepdims=True)
            acc_scr[...] = alpha * acc_scr[...] + jnp.dot(
                p.astype(v.dtype), v, preferred_element_type=jnp.float32)
            m_scr[...] = m_new

        # Only build the causal mask on blocks that intersect the diagonal.
        on_diag = (ki + 1) * tk > qi * tq

        @pl.when(on_diag)
        def _masked():
            row = qi * tq + lax.broadcasted_iota(jnp.int32, (tq, tk), 0)
            col = ki * tk + lax.broadcasted_iota(jnp.int32, (tq, tk), 1)
            _update(jnp.where(col <= row, s, -jnp.inf))

        @pl.when(jnp.logical_not(on_diag))
        def _unmasked():
            _update(s)

    # Write the output as soon as the last needed (diagonal) kv block is done.
    @pl.when(ki == last_needed)
    def _finalize():
        # approx=True: ~1e-3 rel error in the normalization; use approx=False if this
        # head feeds a loss-sensitive path.
        inv_l = pl.reciprocal(l_scr[...], approx=True)
        o_ref[0] = (acc_scr[...] * inv_l).astype(o_ref.dtype)


# ---------------------------------------------------------------------------
# Wrapper
# ---------------------------------------------------------------------------
def attention_head(x, w_key, w_query, w_value, *,
                   q_tile=512, kv_tile=512,
                   proj_t_tile=512, proj_c_tile=512,
                   compute_dtype=jnp.bfloat16):
    """x: (B, T, C); w_*: (H, C) PyTorch-layout Linear weights. Returns (B, T, H)."""
    B, T, C = x.shape
    H = w_key.shape[0]
    out_dtype = x.dtype
    scale = float(C) ** -0.5            # matches the reference (n_embd, not head_size)

    Hp = _round_up(H, 128)              # lane-dense head dim
    Cp = _round_up(C, 128)              # lane-dense contraction dim
    cdt = compute_dtype
    vmem_limit = _vmem_limit_bytes()

    # ---- QKV projection inputs (bf16 operands by default, zero-padded) ----
    x_p = x.astype(cdt)
    if Cp != C:
        x_p = jnp.pad(x_p, ((0, 0), (0, 0), (0, Cp - C)))

    def _prep_w(w, s=1.0):
        w = w.astype(jnp.float32) * s
        w = jnp.pad(w, ((0, Hp - H), (0, Cp - C)))    # zero-pad -> mathematically inert
        return w.T                                    # (Cp, Hp): kernel does x @ W

    # Fused [ scale*Wq | Wk | Wv ]: one weight slab, one pass over x.
    w_all = jnp.concatenate(
        [_prep_w(w_query, scale), _prep_w(w_key), _prep_w(w_value)], axis=1
    ).astype(cdt)                                     # (Cp, 3*Hp)

    tt = _pick_tile(T, proj_t_tile)
    tc = _pick_tile(Cp, proj_c_tile, mult=128)
    nt, ncc = T // tt, Cp // tc

    q_arr, kv_arr = pl.pallas_call(
        functools.partial(_qkv_proj_kernel, Hp=Hp),
        out_shape=(jax.ShapeDtypeStruct((B, T, Hp), cdt),
                   jax.ShapeDtypeStruct((B, T, 2 * Hp), cdt)),
        grid_spec=pltpu.PrefetchScalarGridSpec(
            num_scalar_prefetch=0,
            grid=(B, nt, ncc),
            in_specs=[
                pl.BlockSpec((1, tt, tc), lambda b, t, c: (b, t, c)),
                pl.BlockSpec((tc, 3 * Hp), lambda b, t, c: (c, 0)),
            ],
            out_specs=[
                pl.BlockSpec((1, tt, Hp), lambda b, t, c: (b, t, 0)),
                pl.BlockSpec((1, tt, 2 * Hp), lambda b, t, c: (b, t, 0)),
            ],
            scratch_shapes=[pltpu.VMEM((tt, 3 * Hp), jnp.float32)],
        ),
        compiler_params=pltpu.CompilerParams(
            dimension_semantics=("parallel", "parallel", "arbitrary"),
            vmem_limit_bytes=vmem_limit,
        ),
    )(x_p, w_all)

    # ---- flash attention over precomputed q / [k|v] ----
    tq = _pick_tile(T, q_tile)
    tk = _pick_tile(T, kv_tile)
    nq, nk = T // tq, T // tk

    def _kv_index(b, qi, ki):
        # Clamp at the causal diagonal: dead kv blocks repeat the last needed block
        # index, so Pallas elides their HBM->VMEM DMA entirely.
        last_needed = ((qi + 1) * tq - 1) // tk
        return (b, jnp.minimum(ki, last_needed), 0)

    out_p = pl.pallas_call(
        functools.partial(_flash_kernel, tq=tq, tk=tk, Hp=Hp),
        out_shape=jax.ShapeDtypeStruct((B, T, Hp), out_dtype),
        grid_spec=pltpu.PrefetchScalarGridSpec(
            num_scalar_prefetch=0,
            grid=(B, nq, nk),
            in_specs=[
                pl.BlockSpec((1, tq, Hp), lambda b, qi, ki: (b, qi, 0)),     # q
                pl.BlockSpec((1, tk, 2 * Hp), _kv_index),                    # [k|v]
            ],
            out_specs=pl.BlockSpec((1, tq, Hp), lambda b, qi, ki: (b, qi, 0)),
            scratch_shapes=[
                pltpu.VMEM((tq, 1), jnp.float32),     # running max
                pltpu.VMEM((tq, 1), jnp.float32),     # running denominator
                pltpu.VMEM((tq, Hp), jnp.float32),    # output accumulator
            ],
        ),
        compiler_params=pltpu.CompilerParams(
            dimension_semantics=("parallel", "parallel", "arbitrary"),
            vmem_limit_bytes=vmem_limit,
        ),
    )(q_arr, kv_arr)

    return out_p[..., :H]


# ---------------------------------------------------------------------------
# Reference & test harness
# ---------------------------------------------------------------------------
def _reference(x, w_key, w_query, w_value):
    """Pure-JAX reference mirroring the PyTorch forward (eval mode)."""
    B, T, C = x.shape
    k = x @ w_key.T
    q = x @ w_query.T
    v = x @ w_value.T
    wei = (q @ jnp.swapaxes(k, -2, -1)) * (C ** -0.5)
    tril = jnp.tril(jnp.ones((T, T), dtype=bool))
    wei = jnp.where(tril, wei, -jnp.inf)
    wei = jax.nn.softmax(wei, axis=-1)
    return wei @ v


def _make_inputs(key, B, T, C, H):
    kx, kk, kq, kv = jax.random.split(key, 4)
    x = jax.random.normal(kx, (B, T, C), dtype=jnp.float32)
    bound = 1.0 / math.sqrt(C)
    w_key = jax.random.uniform(kk, (H, C), minval=-bound, maxval=bound)
    w_query = jax.random.uniform(kq, (H, C), minval=-bound, maxval=bound)
    w_value = jax.random.uniform(kv, (H, C), minval=-bound, maxval=bound)
    return x, w_key, w_query, w_value


if __name__ == "__main__":
    key = jax.random.PRNGKey(0)
    k1, k2 = jax.random.split(key)

    # Case 1: small shapes matching the module (block_size == T), f32 compute path.
    B, T, n_embd, head_size = 2, 8, 32, 16
    x, wk, wq, wv = _make_inputs(k1, B, T, n_embd, head_size)
    out = jax.block_until_ready(
        attention_head(x, wk, wq, wv, compute_dtype=jnp.float32))
    ref = _reference(x, wk, wq, wv)
    assert out.shape == (B, T, head_size)
    assert jnp.allclose(out, ref, atol=2e-3, rtol=2e-3), "mismatch vs reference (case 1)"

    # Case 2: larger T with forced tiling, default bf16 MXU path
    # (multiple q/kv tiles, online softmax, causal block skip + DMA clamp, H padding).
    B2, T2, C2, H2 = 2, 256, 128, 64
    x2, wk2, wq2, wv2 = _make_inputs(k2, B2, T2, C2, H2)
    out2 = jax.block_until_ready(
        attention_head(x2, wk2, wq2, wv2, q_tile=128, kv_tile=128))
    ref2 = _reference(x2, wk2, wq2, wv2)
    assert out2.shape == (B2, T2, H2)
    assert jnp.allclose(out2, ref2, atol=2e-2, rtol=2e-2), "mismatch vs reference (case 2)"

    print("KERNEL_OK")
</pallas_src>

<mosaic_0001>
module attributes {stable_mosaic.version = 11 : i64} {
  func.func @_qkv_proj_kernel(%arg0: i32, %arg1: i32, %arg2: i32, %arg3: memref<1x8x128xf32, #tpu.memory_space<vmem>>, %arg4: memref<128x384xf32, #tpu.memory_space<vmem>>, %arg5: memref<1x8x128xf32, #tpu.memory_space<vmem>>, %arg6: memref<1x8x256xf32, #tpu.memory_space<vmem>>, %arg7: memref<8x384xf32, #tpu.memory_space<vmem>>) attributes {dimension_semantics = [#tpu.dimension_semantics<parallel>, #tpu.dimension_semantics<parallel>, #tpu.dimension_semantics<arbitrary>], iteration_bounds = array<i64: 2, 1, 1>, scalar_prefetch = 0 : i64, scratch_operands = 1 : i64, tpu.core_type = #tpu.core_type<tc>, window_params = [{transform_indices = @transform_0, window_bounds = array<i64: 1, 8, 128>}, {transform_indices = @transform_1, window_bounds = array<i64: 128, 384>}, {transform_indices = @transform_2, window_bounds = array<i64: 1, 8, 128>}, {transform_indices = @transform_3, window_bounds = array<i64: 1, 8, 256>}]} {
    %c0_i32 = arith.constant 0 : i32
    %0 = arith.cmpi eq, %arg2, %c0_i32 : i32
    %1 = arith.extui %0 : i1 to i32
    %c0_i32_0 = arith.constant 0 : i32
    %2 = arith.cmpi ne, %1, %c0_i32_0 : i32
    scf.if %2 {
      %cst_11 = arith.constant 0.000000e+00 : f32
      %13 = vector.broadcast %cst_11 : f32 to vector<8x384xf32>
      %c0_12 = arith.constant 0 : index
      %c0_13 = arith.constant 0 : index
      %14 = vector.load %arg7[%c0_12, %c0_13] : memref<8x384xf32, #tpu.memory_space<vmem>>, vector<8x384xf32>
      tpu.vector_store %arg7[%c0_12, %c0_13], %13 {strides = array<i32>} : memref<8x384xf32, #tpu.memory_space<vmem>>, vector<8x384xf32>,
    } else {
    }
    %c0 = arith.constant 0 : index
    %c0_1 = arith.constant 0 : index
    %3 = vector.load %arg7[%c0, %c0_1] : memref<8x384xf32, #tpu.memory_space<vmem>>, vector<8x384xf32>
    %c0_2 = arith.constant 0 : index
    %c0_3 = arith.constant 0 : index
    %c0_4 = arith.constant 0 : index
    %4 = vector.load %arg3[%c0_2, %c0_3, %c0_4] : memref<1x8x128xf32, #tpu.memory_space<vmem>>, vector<1x8x128xf32>
    %5 = vector.shape_cast %4 : vector<1x8x128xf32> to vector<8x128xf32>
    %c0_5 = arith.constant 0 : index
    %c0_6 = arith.constant 0 : index
    %6 = vector.load %arg4[%c0_5, %c0_6] : memref<128x384xf32, #tpu.memory_space<vmem>>, vector<128x384xf32>
    %cst = arith.constant dense<0.000000e+00> : vector<8x384xf32>
    %7 = tpu.matmul %5, %6, %cst {dimension_numbers = #tpu.dot_dimension_numbers<[1], [0], [0], [1], [0, 0, 1, 1], [], []>} : vector<8x128xf32>, vector<128x384xf32>, vector<8x384xf32> -> vector<8x384xf32>
    %8 = arith.addf %3, %7 : vector<8x384xf32>
    %c0_7 = arith.constant 0 : index
    %c0_8 = arith.constant 0 : index
    %9 = vector.load %arg7[%c0_7, %c0_8] : memref<8x384xf32, #tpu.memory_space<vmem>>, vector<8x384xf32>
    tpu.vector_store %arg7[%c0_7, %c0_8], %8 {strides = array<i32>} : memref<8x384xf32, #tpu.memory_space<vmem>>, vector<8x384xf32>,
    %c0_i32_9 = arith.constant 0 : i32
    %10 = arith.cmpi eq, %arg2, %c0_i32_9 : i32
    %11 = arith.extui %10 : i1 to i32
    %c0_i32_10 = arith.constant 0 : i32
    %12 = arith.cmpi ne, %11, %c0_i32_10 : i32
    scf.if %12 {
      %c0_11 = arith.constant 0 : index
      %c0_12 = arith.constant 0 : index
      %13 = vector.load %arg7[%c0_11, %c0_12] : memref<8x384xf32, #tpu.memory_space<vmem>>, vector<8x384xf32>
      %14 = vector.extract_strided_slice %13 {offsets = [0, 0], sizes = [8, 128], strides = [1, 1]} : vector<8x384xf32> to vector<8x128xf32>
      %c0_13 = arith.constant 0 : index
      %c0_14 = arith.constant 0 : index
      %c0_15 = arith.constant 0 : index
      %15 = vector.load %arg5[%c0_13, %c0_14, %c0_15] : memref<1x8x128xf32, #tpu.memory_space<vmem>>, vector<1x8x128xf32>
      %16 = vector.shape_cast %15 : vector<1x8x128xf32> to vector<8x128xf32>
      %17 = vector.shape_cast %14 : vector<8x128xf32> to vector<1x8x128xf32>
      tpu.vector_store %arg5[%c0_13, %c0_14, %c0_15], %17 {strides = array<i32>} : memref<1x8x128xf32, #tpu.memory_space<vmem>>, vector<1x8x128xf32>,
      %18 = vector.extract_strided_slice %13 {offsets = [0, 128], sizes = [8, 256], strides = [1, 1]} : vector<8x384xf32> to vector<8x256xf32>
      %c0_16 = arith.constant 0 : index
      %c0_17 = arith.constant 0 : index
      %c0_18 = arith.constant 0 : index
      %19 = vector.load %arg6[%c0_16, %c0_17, %c0_18] : memref<1x8x256xf32, #tpu.memory_space<vmem>>, vector<1x8x256xf32>
      %20 = vector.shape_cast %19 : vector<1x8x256xf32> to vector<8x256xf32>
      %21 = vector.shape_cast %18 : vector<8x256xf32> to vector<1x8x256xf32>
      tpu.vector_store %arg6[%c0_16, %c0_17, %c0_18], %21 {strides = array<i32>} : memref<1x8x256xf32, #tpu.memory_space<vmem>>, vector<1x8x256xf32>,
    } else {
    }
    return
  }
  func.func @transform_0(%arg0: i32, %arg1: i32, %arg2: i32) -> (i32, i32, i32) {
    %c0_i32 = arith.constant 0 : i32
    return %arg0, %arg1, %arg2 : i32, i32, i32
  }
  func.func @transform_1(%arg0: i32, %arg1: i32, %arg2: i32) -> (i32, i32) {
    %c0_i32 = arith.constant 0 : i32
    %c0_i32_0 = arith.constant 0 : i32
    return %arg2, %c0_i32 : i32, i32
  }
  func.func @transform_2(%arg0: i32, %arg1: i32, %arg2: i32) -> (i32, i32, i32) {
    %c0_i32 = arith.constant 0 : i32
    %c0_i32_0 = arith.constant 0 : i32
    return %arg0, %arg1, %c0_i32 : i32, i32, i32
  }
  func.func @transform_3(%arg0: i32, %arg1: i32, %arg2: i32) -> (i32, i32, i32) {
    %c0_i32 = arith.constant 0 : i32
    %c0_i32_0 = arith.constant 0 : i32
    return %arg0, %arg1, %c0_i32 : i32, i32, i32
  }
}

</mosaic_0001>

<bundles_post_ra>
// kernel: tpu_custom_call.1
= control target key start
LH: loop header
LB: loop body
LE: loop exit
PB: predicated region body
PF: predicated region fallthrough
CT: control target
= control target key end

     0   :  { %9 = vsyncpa [#allocation4], 0  ;;  %s1029_s0 = inlined_call_operand.hbm [shape: f32[2,8,128], index: 0, kind: input, shape index: {}]   ;;  %s1030_s1 = inlined_call_operand.hbm [shape: f32[128,384], index: 1, kind: input, shape index: {}]   ;;  %s1031_s2 = inlined_call_operand.hbm [shape: f32[2,8,128], index: 2, kind: output, shape index: {0}]   ;;  %s1032_s3 = inlined_call_operand.hbm [shape: f32[2,8,256], index: 3, kind: output, shape index: {1}]  }
   0x1   :  { %11 = vsyncpa [#allocation4 + $0x1], 0 }
   0x2   :  { %12 = vsyncpa [#allocation7], 0 }
   0x3   :  { %13 = vsyncpa [#allocation5], 0 }
   0x4   :  { %15 = vsyncpa [#allocation5 + $0x1], 0 }
   0x5   :  { %16 = vsyncpa [#allocation10], 0 }
   0x6   :  { %18 = vsyncpa [#allocation10 + $0x1], 0  ;;  %s863_s12 = smov 0   ;;  %s865_s13 = smov 0  }
   0x7   :  { %s867_s14 = smov 0   ;;  %s869_s15 = smov 0  }
   0x8   :  { %s871_s16 = smov 0   ;;  %s873_s17 = smov 0  }
   0x9 LB: > { %s560_s18 = sadd.s32 4294967295, %s838_s17   ;;  %p562_p0 = scmp.ge.s32.totalorder %s838_s17, 1  ;;  %s838_s17 = sphi %s873_s17, %s24_s17   ;;  %s834_s16 = sphi %s871_s16, %s1043_s16   ;;  %s830_s15 = sphi %s869_s15, %s1042_s15   ;;  %s826_s14 = sphi %s867_s14, %s1041_s14   ;;  %s822_s13 = sphi %s865_s13, %s1040_s13   ;;  %s818_s12 = sphi %s863_s12, %s1039_s12  }
   0xa   : > { %p895_p1 = scmp.eq.s32.totalorder %s560_s18, 0  ;;  %p160_p2 = scmp.lt.s32.totalorder %s838_s17, 3 }
   0xb   : > { %s175_s22 = sshll.u32 %s1030_s1, 4  ;;  %s840_s24 = smov [#allocation6]   ;;  %s176_s22 = int_to_ptr.hbm [resolvable:$true] %s175_s22 }
   0xc   : > { %p903_p3 = pnand %p562_p0, %p160_p2  ;;  %s177_s25 = sshll.u32 %s840_s24, 4  ;;  %s178_s25 = int_to_ptr.vmem [resolvable:$true] %s177_s25 }
   0xd   : > { %p564_p6 = scmp.ge.s32.totalorder %s838_s17, 2  ;;  %s841_s26 = smov 384  }
   0xe   : > { %p590_p4 = pneg %p903_p3  ;;  %s842_s27 = smov 24  }
   0xf   : > { %s561_s28 = sadd.s32 4294967294, %s838_s17   ;;  %s43_s29 = sadd.s32 1, %s834_s16 }
  0x10   : > { %p591_p5 = pnand %p590_p4, %p895_p1  ;;  %s54_s30 = sadd.s32 1, %s826_s14 }
  0x11   : > { %p45_p7 = scmp.ge.s32.totalorder %s43_s29, 2  ;;  %p61_p8 = scmp.ne.s32.totalorder %s826_s14, %s822_s13 }
  0x12   : > { %593 = dma.hbm_to_vmem [thread:$0]  (!%p591_p5), %s176_s22, 6144, %s178_s25, [#allocation7], %s841_s26, %s841_s26, %s842_s27  }
  0x13   : > { %p62_p9 = scmp.eq.s32.totalorder %s838_s17, 0  ;;  %p67_p10 = scmp.ne.s32.totalorder %s822_s13, %s818_s12 }
  0x14   : > { %s1045_s29 = smov (%p45_p7, %s43_s29), 0  ;;  %p119_p13 = scmp.eq.s32.totalorder %s560_s18, 1 }
  0x15   : > { %p922_p11 = por %p62_p9, %p61_p8  ;;  %p928_p12 = por %p895_p1, %p67_p10 }
  0x16   : > { %s47_s6 = ssub.s32 %s834_s16, %s1045_s29  ;;  %p125_p2 = scmp.eq.s32.totalorder %s561_s28, 1 }
  0x17   : > { %p52_p0 = scmp.eq.s32.totalorder %s47_s6, 0  ;;  %p934_p4 = por %p119_p13, %p61_p8 }
  0x18   : > { %p606_p5 = scmp.lt.s32.totalorder %s838_s17, 2  ;;  %p942_p7 = por %p125_p2, %p67_p10 }
  0x19   : > { %s940_s8 = scalar_select %p52_p0, %s826_s14, %s54_s30  }
  0x1a   : > { %s191_s10 = sand.u32 1, %s826_s14   ;;  %s566_s20 = sshll.u32 %s834_s16, 3 }
  0x1b   : > { %s565_s11 = sshll.u32 %s191_s10, 3  ;;  %s201_s18 = scalar_lea.hbm %s1029_s0, %s566_s20 }
  0x1c   : > { %s195_s24 = scalar_lea.vmem [#allocation3], %s565_s11  ;;  %s203_s26 = sshll.u32 %s201_s18, 4  ;;  %s204_s26 = int_to_ptr.hbm [resolvable:$true] %s203_s26 }
  0x1d   : > { %s205_s25 = sshll.u32 %s195_s24, 4  ;;  %p595_p8 = pnand %p606_p5, %p922_p11  ;;  %s206_s25 = int_to_ptr.vmem [resolvable:$true] %s205_s25 }
  0x1e   : > { %s192_s27 = scalar_lea.sflag [#allocation4], %s191_s10  ;;  %214 = sbr.rel (%p903_p3) target bundleno = 213 (0xd5), region = 28 }
  0x1f   : > { %597 = dma.hbm_to_vmem [thread:$0]  (!%p595_p8), %s204_s26, 128, %s206_s25, %s192_s27  }
  0x20   : > { %s956_s28 = sand.u32 (!%p903_p3), 1, %s822_s13  }
  0x21   : > { %s568_s30 = sshll.u32 (!%p903_p3), %s956_s28, 3  ;;  %s217_s6 = scalar_lea.sflag (!%p903_p3), [#allocation4], %s956_s28 }
  0x22   : > { %s962_s11 = scalar_lea.vmem (!%p903_p3), [#allocation3], %s568_s30 }
  0x23   : > { %801 = dma.done.wait (%p928_p12), %s217_s6, 128  }
  0x24   : > { %803 = vsyncadd (%p928_p12), %s217_s6, 4294967168 }
  0x25   : > { %805 = dma.done.wait (%p895_p1), [#allocation7], 6144  }
  0x26   : > { %807 = vsyncadd (%p895_p1), [#allocation7], 4294961152  ;;  %v313_v0 = vld [vmem:[#allocation6 + $0x178] sm:$0xff]  ;;  %v310_v1 = vld [vmem:[#allocation6 + $0x160] sm:$0xff]  ;;  %s574_s19 = sshll.u32 %s830_s15, 3  ;;  %s571_s10 = sshll.u32 %s956_s28, 4 }
  0x27   : > { %354 = vmatpush.msra.mxu2 %v313_v0  ;;  %v311_v2 = vld [vmem:[#allocation6 + $0x168] sm:$0xff]  ;;  %v312_v3 = vld [vmem:[#allocation6 + $0x170] sm:$0xff]  ;;  %v309_v6 = vld [vmem:[#allocation6 + $0x158] sm:$0xff]  ;;  %s406_s5 = scalar_lea.hbm %s1031_s2, %s574_s19  ;;  %s246_s20 = scalar_lea.vmem [#allocation8], %s568_s30 }
  0x28   : > { %v307_v4 = vld [vmem:[#allocation6 + $0x148] sm:$0xff]  ;;  %314 = vmatpush.msra.mxu0 %v311_v2  ;;  %334 = vmatpush.msra.mxu1 %v312_v3  ;;  %v308_v5 = vld [vmem:[#allocation6 + $0x150] sm:$0xff]  ;;  %v305_v7 = vld [vmem:[#allocation6 + $0x138] sm:$0xff]  ;;  %s408_s21 = sshll.u32 %s246_s20, 4  ;;  %s579_s22 = sshll.u32 %s830_s15, 4  ;;  %s409_s21 = int_to_ptr.vmem [resolvable:$true] %s408_s21 }
  0x29   : > { %355 = vmatpush.msra.mxu2 %v310_v1  ;;  %v306_v8 = vld [vmem:[#allocation6 + $0x140] sm:$0xff]  ;;  %v304_v9 = vld [vmem:[#allocation6 + $0x130] sm:$0xff]  ;;  %v303_v11 = vld [vmem:[#allocation6 + $0x128] sm:$0xff]  ;;  %s410_s18 = sshll.u32 %s406_s5, 4  ;;  %s423_s26 = scalar_lea.hbm %s1032_s3, %s579_s22  ;;  %s411_s18 = int_to_ptr.hbm [resolvable:$true] %s410_s18 }
  0x2a   : > { %315 = vmatpush.msra.mxu0 %v308_v5  ;;  %335 = vmatpush.msra.mxu1 %v309_v6  ;;  %v302_v10 = vld [vmem:[#allocation6 + $0x120] sm:$0xff]  ;;  %v301_v12 = vld [vmem:[#allocation6 + $0x118] sm:$0xff]  ;;  %v299_v13 = vld [vmem:[#allocation6 + $0x108] sm:$0xff]  ;;  %s253_s27 = scalar_lea.vmem [#allocation9], %s571_s10  ;;  %s390_s19 = scalar_lea.sflag [#allocation5], %s956_s28 }
  0x2b   : > { %356 = vmatpush.msra.mxu2 %v307_v4  ;;  %v300_v14 = vld [vmem:[#allocation6 + $0x110] sm:$0xff]  ;;  %v298_v15 = vld [vmem:[#allocation6 + $0x100] sm:$0xff]  ;;  %v297_v17 = vld [vmem:[#allocation6 + $0xf8] sm:$0xff]  ;;  %s425_s6 = sshll.u32 %s253_s27, 4  ;;  %s734_s23 = sshra.s32 %s411_s18, 4  ;;  %s735_s23 = int_to_ptr.hbm [resolvable:$true] %s734_s23  ;;  %s426_s6 = int_to_ptr.vmem [resolvable:$true] %s425_s6 }
  0x2c   : > { %316 = vmatpush.msra.mxu0 %v305_v7  ;;  %336 = vmatpush.msra.mxu1 %v306_v8  ;;  %v296_v16 = vld [vmem:[#allocation6 + $0xf0] sm:$0xff]  ;;  %v295_v18 = vld [vmem:[#allocation6 + $0xe8] sm:$0xff]  ;;  %v293_v19 = vld [vmem:[#allocation6 + $0xd8] sm:$0xff]  ;;  %s736_s30 = scalar_lea.hbm %s735_s23, 8  ;;  %s740_s5 = scalar_lea.hbm %s1031_s2, 16 }
  0x2d   : > { %357 = vmatpush.msra.mxu2 %v304_v9  ;;  %v294_v20 = vld [vmem:[#allocation6 + $0xe0] sm:$0xff]  ;;  %v292_v21 = vld [vmem:[#allocation6 + $0xd0] sm:$0xff]  ;;  %v291_v23 = vld [vmem:[#allocation6 + $0xc8] sm:$0xff]  ;;  %p737_p1 = scmp.ne.s32.totalorder %s735_s23, %s736_s30  ;;  %p741_p10 = scmp.lt.s32.totalorder %s735_s23, %s1031_s2 }
  0x2e   : > { %317 = vmatpush.msra.mxu0 %v302_v10  ;;  %337 = vmatpush.msra.mxu1 %v303_v11  ;;  %v290_v22 = vld [vmem:[#allocation6 + $0xc0] sm:$0xff]  ;;  %v289_v24 = vld [vmem:[#allocation6 + $0xb8] sm:$0xff]  ;;  %v287_v25 = vld [vmem:[#allocation6 + $0xa8] sm:$0xff]  ;;  %p742_p11 = scmp.lt.s32.totalorder %s740_s5, %s736_s30 }
  0x2f   : > { %358 = vmatpush.msra.mxu2 %v301_v12  ;;  %v288_v26 = vld [vmem:[#allocation6 + $0xb0] sm:$0xff]  ;;  %v286_v27 = vld [vmem:[#allocation6 + $0xa0] sm:$0xff]  ;;  %v285_v29 = vld [vmem:[#allocation6 + $0x98] sm:$0xff]  ;;  %p738_p3 = pnand %p737_p1, %p934_p4 }
  0x30   : > { %318 = vmatpush.msra.mxu0 %v299_v13  ;;  %338 = vmatpush.msra.mxu1 %v300_v14  ;;  %v284_v28 = vld [vmem:[#allocation6 + $0x90] sm:$0xff]  ;;  %v283_v30 = vld [vmem:[#allocation6 + $0x88] sm:$0xff]  ;;  %v281_v31 = vld [vmem:[#allocation6 + $0x78] sm:$0xff]  ;;  %p743_p12 = por %p742_p11, %p741_p10 }
  0x31   : > { %359 = vmatpush.msra.mxu2 %v298_v15  ;;  %v282_v32 = vld [vmem:[#allocation6 + $0x80] sm:$0xff]  ;;  %v280_v33 = vld [vmem:[#allocation6 + $0x70] sm:$0xff]  ;;  %v279_v35 = vld [vmem:[#allocation6 + $0x68] sm:$0xff]  ;;  %p739_p9 = pneg %p738_p3 }
  0x32   : > { %319 = vmatpush.msra.mxu0 %v296_v16  ;;  %339 = vmatpush.msra.mxu1 %v297_v17  ;;  %v278_v34 = vld [vmem:[#allocation6 + $0x60] sm:$0xff]  ;;  %v277_v36 = vld [vmem:[#allocation6 + $0x58] sm:$0xff]  ;;  %v275_v37 = vld [vmem:[#allocation6 + $0x48] sm:$0xff] }
  0x33   : > { %360 = vmatpush.msra.mxu2 %v295_v18  ;;  %v276_v38 = vld [vmem:[#allocation6 + $0x50] sm:$0xff]  ;;  %v274_v39 = vld [vmem:[#allocation6 + $0x40] sm:$0xff]  ;;  %v273_v41 = vld [vmem:[#allocation6 + $0x38] sm:$0xff]  ;;  %p744_p13 = pnand %p743_p12, %p739_p9 }
  0x34   : > { %320 = vmatpush.msra.mxu0 %v293_v19  ;;  %340 = vmatpush.msra.mxu1 %v294_v20  ;;  %v272_v40 = vld [vmem:[#allocation6 + $0x30] sm:$0xff]  ;;  %v271_v42 = vld [vmem:[#allocation6 + $0x28] sm:$0xff]  ;;  %v269_v43 = vld [vmem:[#allocation6 + $0x18] sm:$0xff] }
  0x35   : > { %361 = vmatpush.msra.mxu2 %v292_v21  ;;  %v270_v44 = vld [vmem:[#allocation6 + $0x20] sm:$0xff]  ;;  %v268_v45 = vld [vmem:[#allocation6 + $0x10] sm:$0xff]  ;;  %v267_v48 = vld [vmem:[#allocation6 + $0x8] sm:$0xff] }
  0x36   : > { %321 = vmatpush.msra.mxu0 %v290_v22  ;;  %341 = vmatpush.msra.mxu1 %v291_v23  ;;  %v265_v46 = vld [vmem:[%s962_s11] sm:$0xff]  ;;  %v266_v47 = vld [vmem:[#allocation6] sm:$0xff]  ;;  %s427_s11 = sshll.u32 %s423_s26, 4  ;;  %s428_s11 = int_to_ptr.hbm [resolvable:$true] %s427_s11 }
  0x37   : > { %362 = vmatpush.msra.mxu2 %v289_v24 }
  0x38   : > { %322 = vmatpush.msra.mxu0 %v287_v25  ;;  %342 = vmatpush.msra.mxu1 %v288_v26 }
  0x39   : > { %363 = vmatpush.msra.mxu2 %v286_v27 }
  0x3a   : > { %323 = vmatpush.msra.mxu0 %v284_v28  ;;  %343 = vmatpush.msra.mxu1 %v285_v29 }
  0x3b   : > { %364 = vmatpush.msra.mxu2 %v283_v30 }
  0x3c   : > { %324 = vmatpush.msra.mxu0 %v281_v31  ;;  %344 = vmatpush.msra.mxu1 %v282_v32 }
  0x3d   : > { %365 = vmatpush.msra.mxu2 %v280_v33 }
  0x3e   : > { %325 = vmatpush.msra.mxu0 %v278_v34  ;;  %345 = vmatpush.msra.mxu1 %v279_v35 }
  0x3f   : > { %366 = vmatpush.msra.mxu2 %v277_v36 }
  0x40   : > { %326 = vmatpush.msra.mxu0 %v275_v37  ;;  %346 = vmatpush.msra.mxu1 %v276_v38 }
  0x41   : > { %367 = vmatpush.msra.mxu2 %v274_v39 }
  0x42   : > { %327 = vmatpush.msra.mxu0 %v272_v40  ;;  %347 = vmatpush.msra.mxu1 %v273_v41 }
  0x43   : > { %368 = vmatpush.msra.mxu2 %v271_v42 }
  0x44   : > { %328 = vmatpush.msra.mxu0 %v269_v43  ;;  %348 = vmatpush.msra.mxu1 %v270_v44 }
  0x45   : > { %369 = vmatpush.msra.mxu2 %v268_v45 }
  0x46   : > { %370 = vmatmul.f32.vlgmr.msra.gmra.mxu2 %v265_v46  ;;  %329 = vmatpush.msra.mxu0 %v266_v47 }
  0x47   : > { %349 = vmatpush.msra.mxu1 %v267_v48  ;;  %330 = vmatmul.f32.vlgmr.msra.gmra.mxu0 %v265_v46 }
  0x48   : > { %350 = vmatmul.f32.vlgmr.msra.gmra.mxu1 %v265_v46 }
  0xc4   : > { %v331_v49 = vpop.f32.mrf.mxu0 }
  0xc5   : > { %386 = vst [vmem:[%s246_s20] sm:$0xff] %v331_v49  ;;  %v351_v50 = vpop.f32.mrf.mxu1 }
  0xc6   : > { %387 = vst [vmem:[%s253_s27] sm:$0xff] %v351_v50 }
  0xc7   : > { %747 = shalt.err (!%p744_p13)
}
  0xc8   : > { %586 = dma.vmem_to_hbm [thread:$0]  (%p934_p4), %s409_s21, 128, %s411_s18, %s390_s19  }
  0xc9   : > { %v371_v51 = vpop.f32.mrf.mxu2  ;;  %s395_s10 = scalar_lea.sflag [#allocation10], %s956_s28  ;;  %s762_s20 = sshra.s32 %s428_s11, 4  ;;  %s763_s20 = int_to_ptr.hbm [resolvable:$true] %s762_s20 }
  0xca   : > { %388 = vst [vmem:[%s253_s27 + $0x8] sm:$0xff] %v371_v51  ;;  %s764_s25 = scalar_lea.hbm %s763_s20, 16  ;;  %s768_s30 = scalar_lea.hbm %s1032_s3, 32 }
  0xcb   : > { %p765_p0 = scmp.ne.s32.totalorder %s763_s20, %s764_s25  ;;  %p769_p8 = scmp.lt.s32.totalorder %s763_s20, %s1032_s3 }
  0xcc   : > { %p770_p1 = scmp.lt.s32.totalorder %s768_s30, %s764_s25 }
  0xcd   : > { %p766_p2 = pnand %p765_p0, %p934_p4 }
  0xce   : > { %p771_p3 = por %p770_p1, %p769_p8 }
  0xcf   : > { %p767_p5 = pneg %p766_p2 }
  0xd1   : > { %p772_p9 = pnand %p771_p3, %p767_p5 }
  0xd3   : > { %775 = shalt.err (!%p772_p9)
}
  0xd4   : > { %587 = dma.vmem_to_hbm [thread:$0]  (%p934_p4), %s426_s6, 256, %s428_s11, %s395_s10  }
  0xd5 PF: > { %s439_s28 = sand.u32 1, %s818_s12   ;;  %p599_p10 = pnand %p564_p6, %p942_p7 }
  0xd6   : > { %s440_s21 = scalar_lea.sflag [#allocation5], %s439_s28 }
  0xd7   : > { %p600_p11 = pneg %p599_p10 }
  0xd9   : > { %809 = dma.done.wait (%p600_p11), %s440_s21, 128  }
  0xda   : > { %811 = vsyncadd (%p600_p11), %s440_s21, 4294967168  ;;  %s450_s18 = scalar_lea.sflag [#allocation10], %s439_s28 }
  0xdb   : > { %813 = dma.done.wait (%p600_p11), %s450_s18, 256  }
  0xdc   : > { %815 = vsyncadd (%p600_p11), %s450_s18, 4294967040  ;;  %s24_s17 = sadd.s32 1, %s838_s17   ;;  %s1039_s12 = smov %s822_s13 }
  0xdd   : > { %p21_p12 = scmp.ge.s32.totalorder %s24_s17, 4   ;;  %s1040_s13 = smov %s826_s14 }
  0xde   : > { %s1041_s14 = smov %s940_s8  ;;  %s1042_s15 = smov %s834_s16 }
  0xdf   : > { %s1043_s16 = smov %s1045_s29  ;;  %23 = sbr.rel (!%p21_p12) target bundleno = 9 (0x9), region = 103 }
  0xe4   :  { %456 = vsyncpa [#allocation4], 1 }
  0xe5   :  { %458 = vsyncpa [#allocation4 + $0x1], 1 }
  0xe6   :  { %459 = vsyncpa [#allocation7], 1 }
  0xe7   :  { %460 = vsyncpa [#allocation5], 1 }
  0xe8   :  { %462 = vsyncpa [#allocation5 + $0x1], 1 }
  0xe9   :  { %463 = vsyncpa [#allocation10], 1 }
  0xea   :  { %465 = vsyncpa [#allocation10 + $0x1], 1 }

</bundles_post_ra>
